<compile_context>
chip_gen: v5e
topology: v5e:2x2
jax: 0.10.0
libtpu: 0.0.40
codegen_flags: <defaults>
</compile_context>

<pallas_src>
import jax
import jax.numpy as jnp
from jax.experimental import pallas as pl
from jax.experimental.pallas import tpu as pltpu

EPS = 1e-5

# When True, grid-invariant (constant index_map) inputs ask the pipeline for a
# single VMEM buffer instead of the default two.  Flipped off as a fallback if
# the installed toolchain rejects it.
_SINGLE_BUFFER_CONSTS = True


# ---------------- small helpers -----------------------------------------------
def _round_up(x, m):
    return ((x + m - 1) // m) * m


def _nbytes(a):
    return int(a.size) * a.dtype.itemsize


def _vmem_capacity_bytes():
    try:
        return int(pltpu.get_tpu_info().vmem_capacity_bytes)
    except Exception:
        return 64 * 1024 * 1024          # conservative (v7x per-core VMEM)


def _vmem_limit(request_bytes):
    """Explicit scoped-VMEM limit: actual footprint + headroom, capped by HW."""
    cap = _vmem_capacity_bytes()
    want = max(int(request_bytes) + (8 << 20), 32 << 20)
    return int(min(want, int(cap * 0.85)))


def _resident_weight_budget():
    # Body-layer weights kept VMEM-resident per fused call; ~35% of VMEM so
    # activation tiles, double buffers and compiler scratch still fit.
    return int(_vmem_capacity_bytes() * 0.35)


def _row_tile_cap(resident_bytes):
    # Bigger activation tiles amortize the ~0.35us per-grid-step overhead
    # (v5e/v6e have the VMEM headroom); stay smaller when the resident weight
    # footprint is already large (v7x's 64 MiB VMEM).
    if resident_bytes <= (8 << 20):
        return 1024
    if resident_bytes <= (24 << 20):
        return 512
    return 256


def _row_tile(n, cap):
    """Row-tile size (multiple of 16 for bf16 sublane packing) and padded N."""
    tn = min(cap, _round_up(max(n, 1), 16))
    # Prefer >=2 row tiles so dual-TensorCore chips (v7x) can shard the grid.
    while tn > 16 and _round_up(n, tn) // tn < 2:
        tn = _round_up(tn // 2, 16)
    return tn, _round_up(n, tn)


def _const_pipeline_mode():
    if not _SINGLE_BUFFER_CONSTS:
        return None
    try:
        return pl.Buffered(1)
    except Exception:
        return None


def _const_spec(shape, index_map):
    mode = _const_pipeline_mode()
    if mode is not None:
        try:
            return pl.BlockSpec(shape, index_map, pipeline_mode=mode)
        except TypeError:
            pass
    return pl.BlockSpec(shape, index_map)


# ---------------- kernel 1: fused hidden MLP body ------------------------------
# (Linear -> RMSNorm -> GELU) for every layer in the group.  Layer weights stay
# VMEM-resident (constant index_map, single-buffered); activation rows stream
# through in bf16 tiles, matmuls are bf16 x bf16 with f32 accumulation.
def make_mlp_body_kernel(n_layers, hidden_true):
    inv_h = 1.0 / float(hidden_true)

    def kernel(*refs):
        x_ref, o_ref = refs[0], refs[-1]
        h = x_ref[...]                                   # bf16 tile
        for li in range(n_layers):
            w_ref = refs[1 + 3 * li]
            b_ref = refs[2 + 3 * li]
            g_ref = refs[3 + 3 * li]
            h = jnp.dot(h.astype(jnp.bfloat16), w_ref[...],
                        preferred_element_type=jnp.float32) + b_ref[...]
            # RMSNorm: f32 stats over the TRUE hidden dim (padding lanes are 0).
            ms = jnp.sum(h * h, axis=-1, keepdims=True) * inv_h
            h = g_ref[...] * (h * jax.lax.rsqrt(ms + EPS))
            # TODO(synk): PyTorch nn.GELU() default is exact erf; tanh approx used.
            h = jax.nn.gelu(h, approximate=True)
        o_ref[...] = h.astype(o_ref.dtype)

    return kernel


def _mlp_group(x, layers, hidden_true, tn):
    n_pad, din = x.shape
    hid = layers[-1][0].shape[1]
    consts = [a for layer in layers for a in layer]
    const_bytes = sum(_nbytes(a) for a in consts)
    const_bufs = 1 if _const_pipeline_mode() is not None else 2

    in_specs = [pl.BlockSpec((tn, din), lambda i: (i, 0))]
    in_specs += [_const_spec(c.shape, lambda i: (0, 0)) for c in consts]

    tile_bytes = (2 * tn * din * x.dtype.itemsize      # input tile, double-buffered
                  + 2 * tn * hid * 2                   # bf16 output tile, double-buffered
                  + 4 * tn * max(din, hid) * 4)        # f32 temporaries / spill slack

    return pl.pallas_call(
        make_mlp_body_kernel(len(layers), hidden_true),
        out_shape=jax.ShapeDtypeStruct((n_pad, hid), jnp.bfloat16),
        grid=(n_pad // tn,),
        in_specs=in_specs,
        out_specs=pl.BlockSpec((tn, hid), lambda i: (i, 0)),
        compiler_params=pltpu.CompilerParams(
            dimension_semantics=("parallel",),
            vmem_limit_bytes=_vmem_limit(const_bufs * const_bytes + tile_bytes)),
    )(x, *consts)


def _group_layers(layers, budget_bytes):
    """Greedy grouping so each fused call's resident weights fit the budget
    (weight-streaming fallback for small-VMEM chips; groups hand off in bf16)."""
    groups, cur, cur_bytes = [], [], 0
    for layer in layers:
        nb = sum(_nbytes(a) for a in layer)
        if cur and cur_bytes + nb > budget_bytes:
            groups.append(cur)
            cur, cur_bytes = [], 0
        cur.append(layer)
        cur_bytes += nb
    if cur:
        groups.append(cur)
    return groups


def mlp_body(x2d, layers, hidden_true, tn):
    h = x2d
    for group in _group_layers(layers, _resident_weight_budget()):
        h = _mlp_group(h, group, hidden_true, tn)
    return h                                                  # (n_pad, H_p) bf16


# ---------------- kernel 2: vocab projection -----------------------------------
def _vocab_kernel(x_ref, w_ref, b_ref, o_ref):
    o_ref[...] = (jnp.dot(x_ref[...], w_ref[...],
                          preferred_element_type=jnp.float32)
                  + b_ref[...]).astype(o_ref.dtype)


def vocab_linear(x2d, w, b, tn, *, tile_cols=1024):
    n_pad, h = x2d.shape
    v_pad = w.shape[1]                       # already a multiple of 128 (pack time)
    tv = min(tile_cols, v_pad)
    while v_pad % tv:
        tv -= 128

    n_tiles_r = n_pad // tn
    n_tiles_v = v_pad // tv

    # Grid-order selection: the innermost grid axis decides which operand gets
    # re-streamed from HBM on every step -- pick the cheaper one.
    rows_inner = n_tiles_v * _nbytes(x2d) < n_tiles_r * _nbytes(w)

    if rows_inner:                           # each W tile fetched once, x re-streamed
        grid = (n_tiles_v, n_tiles_r)
        x_spec = pl.BlockSpec((tn, h), lambda j, i: (i, 0))
        w_spec = pl.BlockSpec((h, tv), lambda j, i: (0, j))
        b_spec = pl.BlockSpec((1, tv), lambda j, i: (0, j))
        o_spec = pl.BlockSpec((tn, tv), lambda j, i: (i, j))
    else:                                    # each x tile fetched once, W re-streamed
        grid = (n_tiles_r, n_tiles_v)
        x_spec = pl.BlockSpec((tn, h), lambda i, j: (i, 0))
        w_spec = pl.BlockSpec((h, tv), lambda i, j: (0, j))
        b_spec = pl.BlockSpec((1, tv), lambda i, j: (0, j))
        o_spec = pl.BlockSpec((tn, tv), lambda i, j: (i, j))

    tile_bytes = 2 * (tn * h * x2d.dtype.itemsize + h * tv * w.dtype.itemsize
                      + tn * tv * 4 + tv * 4)

    return pl.pallas_call(
        _vocab_kernel,
        out_shape=jax.ShapeDtypeStruct((n_pad, v_pad), jnp.float32),
        grid=grid,
        in_specs=[x_spec, w_spec, b_spec],
        out_specs=o_spec,
        compiler_params=pltpu.CompilerParams(
            dimension_semantics=("parallel", "parallel"),
            vmem_limit_bytes=_vmem_limit(tile_bytes)),
    )(x2d, w, b)


# ---------------- full forward ---------------------------------------------------
def kgram_mlp_seq_forward(tokens_seq, packed):
    """tokens_seq: (seq_len S, batch B) int32 -> logits (S, B, vocab) float32."""
    S, B = tokens_seq.shape
    k = packed["k"]
    emb = packed["embedding"]                                    # (V, E) f32
    V = packed["vocab"]

    # TODO(synk): k-gram window + embedding gather (jnp.take) stay in XLA; the
    # data-dependent row gather has no clean rectangular BlockSpec tile form.
    # (The k-way concat could further be folded into the first matmul's K dim.)
    pad = jnp.zeros((k - 1, B), tokens_seq.dtype)
    padded = jnp.concatenate([pad, tokens_seq], axis=0)          # (S+k-1, B)
    emb_padded = jnp.take(emb, padded, axis=0)                   # (S+k-1, B, E)
    kgram_emb = jnp.concatenate([emb_padded[i:i + S] for i in range(k)],
                                axis=-1)                         # (S, B, k*E)

    # Rows stay in (seq, batch) order end to end -> no layout permutes.
    x2d = kgram_emb.reshape(S * B, -1)                           # (S*B, k*E)
    din_p = packed["body"][0][0].shape[0]
    if x2d.shape[1] != din_p:
        x2d = jnp.pad(x2d, ((0, 0), (0, din_p - x2d.shape[1])))
    x2d = x2d.astype(jnp.bfloat16)                               # bf16 streaming

    n = S * B
    body_bytes = sum(_nbytes(a) for layer in packed["body"] for a in layer)
    tn, n_pad = _row_tile(n, _row_tile_cap(min(body_bytes,
                                               _resident_weight_budget())))
    if n_pad != n:
        x2d = jnp.pad(x2d, ((0, n_pad - n), (0, 0)))

    h2d = mlp_body(x2d, packed["body"], packed["hidden"], tn)    # (n_pad, Hp) bf16
    logits2d = vocab_linear(h2d, packed["w_out"], packed["b_out"], tn)  # f32
    return logits2d[:n, :V].reshape(S, B, V)                     # (S, B, V)


# ---------------- parameters ------------------------------------------------------
def init_params(key, vocab_size, k, embed_size, num_inner_layers):
    """Logical float32 parameters mirroring the PyTorch module."""
    hidden = embed_size
    keys = jax.random.split(key, 3 + num_inner_layers)
    embedding = jax.random.normal(keys[0], (vocab_size, embed_size), jnp.float32)

    def linear(kk, din, dout):
        lim = 1.0 / (din ** 0.5)
        w = jax.random.uniform(kk, (din, dout), jnp.float32, -lim, lim)
        return (w,                                   # weight (in, out)
                jnp.zeros((1, dout), jnp.float32),   # bias
                jnp.ones((1, dout), jnp.float32))    # RMSNorm gain

    body = [linear(keys[1], k * embed_size, hidden)]
    for li in range(num_inner_layers):
        body.append(linear(keys[2 + li], hidden, hidden))
    w_out, b_out, _ = linear(keys[2 + num_inner_layers], hidden, vocab_size)
    return {"k": k, "embedding": embedding, "body": body,
            "w_out": w_out, "b_out": b_out}


def pack_params(params):
    """One-time packing: pad every matmul feature dim (k*E, H, V) to a multiple of
    128 (lane-dense / full MXU tiles) and cast weights to bf16.  Zero padding is
    exact because RMSNorm divides by the true hidden size and GELU(0) = 0."""
    k = params["k"]
    emb = params["embedding"]
    V, E = emb.shape
    body = params["body"]
    H = body[0][0].shape[1]
    din0 = k * E
    din0_p, H_p, V_p = (_round_up(d, 128) for d in (din0, H, V))

    def pad2(a, rows, cols):
        return jnp.pad(a, ((0, rows - a.shape[0]), (0, cols - a.shape[1])))

    packed_body = []
    for idx, (w, b, g) in enumerate(body):
        in_p = din0_p if idx == 0 else H_p
        packed_body.append((pad2(w, in_p, H_p).astype(jnp.bfloat16),
                            pad2(b, 1, H_p), pad2(g, 1, H_p)))

    return {"k": k, "embedding": emb, "body": packed_body,
            "w_out": pad2(params["w_out"], H_p, V_p).astype(jnp.bfloat16),
            "b_out": pad2(params["b_out"], 1, V_p),
            "hidden": H, "vocab": V}


# ---------------- pure-JAX reference (correctness check) --------------------------
def reference_forward(tokens_seq, packed):
    """f32 math on the same (bf16-quantized, padded) weights as the kernels."""
    S, B = tokens_seq.shape
    k = packed["k"]
    emb = packed["embedding"]
    V, H = packed["vocab"], packed["hidden"]

    pad = jnp.zeros((k - 1, B), tokens_seq.dtype)
    padded = jnp.concatenate([pad, tokens_seq], axis=0)
    emb_padded = jnp.take(emb, padded, axis=0)
    kg = jnp.concatenate([emb_padded[i:i + S] for i in range(k)], axis=-1)
    h = kg.reshape(S * B, -1)
    h = jnp.pad(h, ((0, 0), (0, packed["body"][0][0].shape[0] - h.shape[1])))
    for (w, b, g) in packed["body"]:
        h = h @ w.astype(jnp.float32) + b
        ms = jnp.sum(h * h, axis=-1, keepdims=True) / H
        h = g * (h * jax.lax.rsqrt(ms + EPS))
        h = jax.nn.gelu(h, approximate=True)
    logits = h @ packed["w_out"].astype(jnp.float32) + packed["b_out"]
    return logits[:, :V].reshape(S, B, V)


def _run_forward(tokens, packed):
    """Run the Pallas forward; fall back to double-buffered constant weights if
    the installed toolchain rejects single-buffered (pl.Buffered(1)) inputs."""
    global _SINGLE_BUFFER_CONSTS
    try:
        return kgram_mlp_seq_forward(tokens, packed)
    except Exception:
        if not _SINGLE_BUFFER_CONSTS:
            raise
        _SINGLE_BUFFER_CONSTS = False
        return kgram_mlp_seq_forward(tokens, packed)


if __name__ == "__main__":
    VOCAB, K, EMBED, INNER = 128, 3, 32, 1
    S, B = 8, 2

    key = jax.random.PRNGKey(0)
    k_tok, k_par = jax.random.split(key)
    tokens = jax.random.randint(k_tok, (S, B), 0, VOCAB, dtype=jnp.int32)
    params = init_params(k_par, VOCAB, K, EMBED, INNER)
    packed = pack_params(params)            # one-time: pad to 128 + bf16 cast

    logits = _run_forward(tokens, packed)
    jax.block_until_ready(logits)

    assert logits.shape == (S, B, VOCAB)
    assert bool(jnp.all(jnp.isfinite(logits)))

    ref = reference_forward(tokens, packed)
    err = float(jnp.max(jnp.abs(logits - ref)))
    assert err < 5e-2, f"max abs err vs reference: {err}"

    print("KERNEL_OK")
</pallas_src>

<mosaic_0001>
module attributes {stable_mosaic.version = 11 : i64} {
  func.func @kernel(%arg0: i32, %arg1: memref<16x128xbf16, #tpu.memory_space<vmem>>, %arg2: memref<128x128xbf16, #tpu.memory_space<vmem>>, %arg3: memref<1x128xf32, #tpu.memory_space<vmem>>, %arg4: memref<1x128xf32, #tpu.memory_space<vmem>>, %arg5: memref<128x128xbf16, #tpu.memory_space<vmem>>, %arg6: memref<1x128xf32, #tpu.memory_space<vmem>>, %arg7: memref<1x128xf32, #tpu.memory_space<vmem>>, %arg8: memref<16x128xbf16, #tpu.memory_space<vmem>>) attributes {dimension_semantics = [#tpu.dimension_semantics<parallel>], iteration_bounds = array<i64: 1>, scalar_prefetch = 0 : i64, scratch_operands = 0 : i64, tpu.core_type = #tpu.core_type<tc>, window_params = [{transform_indices = @transform_0, window_bounds = array<i64: 16, 128>}, {pipeline_mode = #tpu.pipeline_mode<synchronous>, transform_indices = @transform_1, window_bounds = array<i64: 128, 128>}, {pipeline_mode = #tpu.pipeline_mode<synchronous>, transform_indices = @transform_2, window_bounds = array<i64: 1, 128>}, {pipeline_mode = #tpu.pipeline_mode<synchronous>, transform_indices = @transform_3, window_bounds = array<i64: 1, 128>}, {pipeline_mode = #tpu.pipeline_mode<synchronous>, transform_indices = @transform_4, window_bounds = array<i64: 128, 128>}, {pipeline_mode = #tpu.pipeline_mode<synchronous>, transform_indices = @transform_5, window_bounds = array<i64: 1, 128>}, {pipeline_mode = #tpu.pipeline_mode<synchronous>, transform_indices = @transform_6, window_bounds = array<i64: 1, 128>}, {transform_indices = @transform_7, window_bounds = array<i64: 16, 128>}]} {
    %c0 = arith.constant 0 : index
    %c0_0 = arith.constant 0 : index
    %0 = vector.load %arg1[%c0, %c0_0] : memref<16x128xbf16, #tpu.memory_space<vmem>>, vector<16x128xbf16>
    %c0_1 = arith.constant 0 : index
    %c0_2 = arith.constant 0 : index
    %1 = vector.load %arg2[%c0_1, %c0_2] : memref<128x128xbf16, #tpu.memory_space<vmem>>, vector<128x128xbf16>
    %cst = arith.constant dense<0.000000e+00> : vector<16x128xf32>
    %2 = tpu.matmul %0, %1, %cst {dimension_numbers = #tpu.dot_dimension_numbers<[1], [0], [0], [1], [0, 0, 1, 1], [], []>} : vector<16x128xbf16>, vector<128x128xbf16>, vector<16x128xf32> -> vector<16x128xf32>
    %c0_3 = arith.constant 0 : index
    %c0_4 = arith.constant 0 : index
    %3 = vector.load %arg3[%c0_3, %c0_4] : memref<1x128xf32, #tpu.memory_space<vmem>>, vector<1x128xf32>
    %4 = vector.broadcast %3 : vector<1x128xf32> to vector<16x128xf32>
    %5 = arith.addf %2, %4 : vector<16x128xf32>
    %6 = arith.mulf %5, %5 : vector<16x128xf32>
    %cst_5 = arith.constant dense<0.000000e+00> : vector<16xf32>
    %7 = vector.multi_reduction <add>, %6, %cst_5 [1] : vector<16x128xf32> to vector<16xf32>
    %8 = vector.shape_cast %7 : vector<16xf32> to vector<16x1xf32>
    %cst_6 = arith.constant 3.125000e-02 : f32
    %9 = vector.broadcast %cst_6 : f32 to vector<16x1xf32>
    %10 = arith.mulf %8, %9 : vector<16x1xf32>
    %c0_7 = arith.constant 0 : index
    %c0_8 = arith.constant 0 : index
    %11 = vector.load %arg4[%c0_7, %c0_8] : memref<1x128xf32, #tpu.memory_space<vmem>>, vector<1x128xf32>
    %cst_9 = arith.constant 9.99999974E-6 : f32
    %12 = vector.broadcast %cst_9 : f32 to vector<16x1xf32>
    %13 = arith.addf %10, %12 : vector<16x1xf32>
    %14 = math.rsqrt %13 : vector<16x1xf32>
    %15 = vector.broadcast %14 : vector<16x1xf32> to vector<16x128xf32>
    %16 = arith.mulf %5, %15 : vector<16x128xf32>
    %17 = vector.broadcast %11 : vector<1x128xf32> to vector<16x128xf32>
    %18 = arith.mulf %17, %16 : vector<16x128xf32>
    %19 = arith.mulf %18, %18 : vector<16x128xf32>
    %20 = arith.mulf %18, %19 : vector<16x128xf32>
    %cst_10 = arith.constant 4.471500e-02 : f32
    %21 = vector.broadcast %cst_10 : f32 to vector<16x128xf32>
    %22 = arith.mulf %21, %20 : vector<16x128xf32>
    %23 = arith.addf %18, %22 : vector<16x128xf32>
    %cst_11 = arith.constant 0.797884583 : f32
    %24 = vector.broadcast %cst_11 : f32 to vector<16x128xf32>
    %25 = arith.mulf %24, %23 : vector<16x128xf32>
    %26 = math.tanh %25 : vector<16x128xf32>
    %cst_12 = arith.constant 1.000000e+00 : f32
    %27 = vector.broadcast %cst_12 : f32 to vector<16x128xf32>
    %28 = arith.addf %27, %26 : vector<16x128xf32>
    %cst_13 = arith.constant 5.000000e-01 : f32
    %29 = vector.broadcast %cst_13 : f32 to vector<16x128xf32>
    %30 = arith.mulf %29, %28 : vector<16x128xf32>
    %31 = arith.mulf %18, %30 : vector<16x128xf32>
    %32 = arith.truncf %31 : vector<16x128xf32> to vector<16x128xbf16>
    %c0_14 = arith.constant 0 : index
    %c0_15 = arith.constant 0 : index
    %33 = vector.load %arg5[%c0_14, %c0_15] : memref<128x128xbf16, #tpu.memory_space<vmem>>, vector<128x128xbf16>
    %cst_16 = arith.constant dense<0.000000e+00> : vector<16x128xf32>
    %34 = tpu.matmul %32, %33, %cst_16 {dimension_numbers = #tpu.dot_dimension_numbers<[1], [0], [0], [1], [0, 0, 1, 1], [], []>} : vector<16x128xbf16>, vector<128x128xbf16>, vector<16x128xf32> -> vector<16x128xf32>
    %c0_17 = arith.constant 0 : index
    %c0_18 = arith.constant 0 : index
    %35 = vector.load %arg6[%c0_17, %c0_18] : memref<1x128xf32, #tpu.memory_space<vmem>>, vector<1x128xf32>
    %36 = vector.broadcast %35 : vector<1x128xf32> to vector<16x128xf32>
    %37 = arith.addf %34, %36 : vector<16x128xf32>
    %38 = arith.mulf %37, %37 : vector<16x128xf32>
    %cst_19 = arith.constant dense<0.000000e+00> : vector<16xf32>
    %39 = vector.multi_reduction <add>, %38, %cst_19 [1] : vector<16x128xf32> to vector<16xf32>
    %40 = vector.shape_cast %39 : vector<16xf32> to vector<16x1xf32>
    %cst_20 = arith.constant 3.125000e-02 : f32
    %41 = vector.broadcast %cst_20 : f32 to vector<16x1xf32>
    %42 = arith.mulf %40, %41 : vector<16x1xf32>
    %c0_21 = arith.constant 0 : index
    %c0_22 = arith.constant 0 : index
    %43 = vector.load %arg7[%c0_21, %c0_22] : memref<1x128xf32, #tpu.memory_space<vmem>>, vector<1x128xf32>
    %cst_23 = arith.constant 9.99999974E-6 : f32
    %44 = vector.broadcast %cst_23 : f32 to vector<16x1xf32>
    %45 = arith.addf %42, %44 : vector<16x1xf32>
    %46 = math.rsqrt %45 : vector<16x1xf32>
    %47 = vector.broadcast %46 : vector<16x1xf32> to vector<16x128xf32>
    %48 = arith.mulf %37, %47 : vector<16x128xf32>
    %49 = vector.broadcast %43 : vector<1x128xf32> to vector<16x128xf32>
    %50 = arith.mulf %49, %48 : vector<16x128xf32>
    %51 = arith.mulf %50, %50 : vector<16x128xf32>
    %52 = arith.mulf %50, %51 : vector<16x128xf32>
    %cst_24 = arith.constant 4.471500e-02 : f32
    %53 = vector.broadcast %cst_24 : f32 to vector<16x128xf32>
    %54 = arith.mulf %53, %52 : vector<16x128xf32>
    %55 = arith.addf %50, %54 : vector<16x128xf32>
    %cst_25 = arith.constant 0.797884583 : f32
    %56 = vector.broadcast %cst_25 : f32 to vector<16x128xf32>
    %57 = arith.mulf %56, %55 : vector<16x128xf32>
    %58 = math.tanh %57 : vector<16x128xf32>
    %cst_26 = arith.constant 1.000000e+00 : f32
    %59 = vector.broadcast %cst_26 : f32 to vector<16x128xf32>
    %60 = arith.addf %59, %58 : vector<16x128xf32>
    %cst_27 = arith.constant 5.000000e-01 : f32
    %61 = vector.broadcast %cst_27 : f32 to vector<16x128xf32>
    %62 = arith.mulf %61, %60 : vector<16x128xf32>
    %63 = arith.mulf %50, %62 : vector<16x128xf32>
    %64 = arith.truncf %63 : vector<16x128xf32> to vector<16x128xbf16>
    %c0_28 = arith.constant 0 : index
    %c0_29 = arith.constant 0 : index
    %65 = vector.load %arg8[%c0_28, %c0_29] : memref<16x128xbf16, #tpu.memory_space<vmem>>, vector<16x128xbf16>
    tpu.vector_store %arg8[%c0_28, %c0_29], %64 {strides = array<i32>} : memref<16x128xbf16, #tpu.memory_space<vmem>>, vector<16x128xbf16>,
    return
  }
  func.func @transform_0(%arg0: i32) -> (i32, i32) {
    %c0_i32 = arith.constant 0 : i32
    %c0_i32_0 = arith.constant 0 : i32
    return %arg0, %c0_i32 : i32, i32
  }
  func.func @transform_1(%arg0: i32) -> (i32, i32) {
    %c0_i32 = arith.constant 0 : i32
    %c0_i32_0 = arith.constant 0 : i32
    %c0_i32_1 = arith.constant 0 : i32
    return %c0_i32, %c0_i32_0 : i32, i32
  }
  func.func @transform_2(%arg0: i32) -> (i32, i32) {
    %c0_i32 = arith.constant 0 : i32
    %c0_i32_0 = arith.constant 0 : i32
    %c0_i32_1 = arith.constant 0 : i32
    return %c0_i32, %c0_i32_0 : i32, i32
  }
  func.func @transform_3(%arg0: i32) -> (i32, i32) {
    %c0_i32 = arith.constant 0 : i32
    %c0_i32_0 = arith.constant 0 : i32
    %c0_i32_1 = arith.constant 0 : i32
    return %c0_i32, %c0_i32_0 : i32, i32
  }
  func.func @transform_4(%arg0: i32) -> (i32, i32) {
    %c0_i32 = arith.constant 0 : i32
    %c0_i32_0 = arith.constant 0 : i32
    %c0_i32_1 = arith.constant 0 : i32
    return %c0_i32, %c0_i32_0 : i32, i32
  }
  func.func @transform_5(%arg0: i32) -> (i32, i32) {
    %c0_i32 = arith.constant 0 : i32
    %c0_i32_0 = arith.constant 0 : i32
    %c0_i32_1 = arith.constant 0 : i32
    return %c0_i32, %c0_i32_0 : i32, i32
  }
  func.func @transform_6(%arg0: i32) -> (i32, i32) {
    %c0_i32 = arith.constant 0 : i32
    %c0_i32_0 = arith.constant 0 : i32
    %c0_i32_1 = arith.constant 0 : i32
    return %c0_i32, %c0_i32_0 : i32, i32
  }
  func.func @transform_7(%arg0: i32) -> (i32, i32) {
    %c0_i32 = arith.constant 0 : i32
    %c0_i32_0 = arith.constant 0 : i32
    return %arg0, %c0_i32 : i32, i32
  }
}

module attributes {stable_mosaic.version = 11 : i64} {
  func.func @kernel(%arg0: i32, %arg1: memref<16x128xbf16, #tpu.memory_space<vmem>>, %arg2: memref<128x128xbf16, #tpu.memory_space<vmem>>, %arg3: memref<1x128xf32, #tpu.memory_space<vmem>>, %arg4: memref<1x128xf32, #tpu.memory_space<vmem>>, %arg5: memref<128x128xbf16, #tpu.memory_space<vmem>>, %arg6: memref<1x128xf32, #tpu.memory_space<vmem>>, %arg7: memref<1x128xf32, #tpu.memory_space<vmem>>, %arg8: memref<16x128xbf16, #tpu.memory_space<vmem>>) attributes {dimension_semantics = [#tpu.dimension_semantics<parallel>], iteration_bounds = array<i64: 1>, scalar_prefetch = 0 : i64, scratch_operands = 0 : i64, tpu.core_type = #tpu.core_type<tc>, window_params = [{transform_indices = @transform_0, window_bounds = array<i64: 16, 128>}, {pipeline_mode = #tpu.pipeline_mode<synchronous>, transform_indices = @transform_1, window_bounds = array<i64: 128, 128>}, {pipeline_mode = #tpu.pipeline_mode<synchronous>, transform_indices = @transform_2, window_bounds = array<i64: 1, 128>}, {pipeline_mode = #tpu.pipeline_mode<synchronous>, transform_indices = @transform_3, window_bounds = array<i64: 1, 128>}, {pipeline_mode = #tpu.pipeline_mode<synchronous>, transform_indices = @transform_4, window_bounds = array<i64: 128, 128>}, {pipeline_mode = #tpu.pipeline_mode<synchronous>, transform_indices = @transform_5, window_bounds = array<i64: 1, 128>}, {pipeline_mode = #tpu.pipeline_mode<synchronous>, transform_indices = @transform_6, window_bounds = array<i64: 1, 128>}, {transform_indices = @transform_7, window_bounds = array<i64: 16, 128>}]} {
    %c0 = arith.constant 0 : index
    %c0_0 = arith.constant 0 : index
    %0 = vector.load %arg1[%c0, %c0_0] : memref<16x128xbf16, #tpu.memory_space<vmem>>, vector<16x128xbf16>
    %c0_1 = arith.constant 0 : index
    %c0_2 = arith.constant 0 : index
    %1 = vector.load %arg2[%c0_1, %c0_2] : memref<128x128xbf16, #tpu.memory_space<vmem>>, vector<128x128xbf16>
    %cst = arith.constant dense<0.000000e+00> : vector<16x128xf32>
    %2 = tpu.matmul %0, %1, %cst {dimension_numbers = #tpu.dot_dimension_numbers<[1], [0], [0], [1], [0, 0, 1, 1], [], []>} : vector<16x128xbf16>, vector<128x128xbf16>, vector<16x128xf32> -> vector<16x128xf32>
    %c0_3 = arith.constant 0 : index
    %c0_4 = arith.constant 0 : index
    %3 = vector.load %arg3[%c0_3, %c0_4] : memref<1x128xf32, #tpu.memory_space<vmem>>, vector<1x128xf32>
    %4 = vector.broadcast %3 : vector<1x128xf32> to vector<16x128xf32>
    %5 = arith.addf %2, %4 : vector<16x128xf32>
    %6 = arith.mulf %5, %5 : vector<16x128xf32>
    %cst_5 = arith.constant dense<0.000000e+00> : vector<16xf32>
    %7 = vector.multi_reduction <add>, %6, %cst_5 [1] : vector<16x128xf32> to vector<16xf32>
    %8 = vector.shape_cast %7 : vector<16xf32> to vector<16x1xf32>
    %cst_6 = arith.constant 3.125000e-02 : f32
    %9 = vector.broadcast %cst_6 : f32 to vector<16x1xf32>
    %10 = arith.mulf %8, %9 : vector<16x1xf32>
    %c0_7 = arith.constant 0 : index
    %c0_8 = arith.constant 0 : index
    %11 = vector.load %arg4[%c0_7, %c0_8] : memref<1x128xf32, #tpu.memory_space<vmem>>, vector<1x128xf32>
    %cst_9 = arith.constant 9.99999974E-6 : f32
    %12 = vector.broadcast %cst_9 : f32 to vector<16x1xf32>
    %13 = arith.addf %10, %12 : vector<16x1xf32>
    %14 = math.rsqrt %13 : vector<16x1xf32>
    %15 = vector.broadcast %14 : vector<16x1xf32> to vector<16x128xf32>
    %16 = arith.mulf %5, %15 : vector<16x128xf32>
    %17 = vector.broadcast %11 : vector<1x128xf32> to vector<16x128xf32>
    %18 = arith.mulf %17, %16 : vector<16x128xf32>
    %19 = arith.mulf %18, %18 : vector<16x128xf32>
    %20 = arith.mulf %18, %19 : vector<16x128xf32>
    %cst_10 = arith.constant 4.471500e-02 : f32
    %21 = vector.broadcast %cst_10 : f32 to vector<16x128xf32>
    %22 = arith.mulf %21, %20 : vector<16x128xf32>
    %23 = arith.addf %18, %22 : vector<16x128xf32>
    %cst_11 = arith.constant 0.797884583 : f32
    %24 = vector.broadcast %cst_11 : f32 to vector<16x128xf32>
    %25 = arith.mulf %24, %23 : vector<16x128xf32>
    %26 = math.tanh %25 : vector<16x128xf32>
    %cst_12 = arith.constant 1.000000e+00 : f32
    %27 = vector.broadcast %cst_12 : f32 to vector<16x128xf32>
    %28 = arith.addf %27, %26 : vector<16x128xf32>
    %cst_13 = arith.constant 5.000000e-01 : f32
    %29 = vector.broadcast %cst_13 : f32 to vector<16x128xf32>
    %30 = arith.mulf %29, %28 : vector<16x128xf32>
    %31 = arith.mulf %18, %30 : vector<16x128xf32>
    %32 = arith.truncf %31 : vector<16x128xf32> to vector<16x128xbf16>
    %c0_14 = arith.constant 0 : index
    %c0_15 = arith.constant 0 : index
    %33 = vector.load %arg5[%c0_14, %c0_15] : memref<128x128xbf16, #tpu.memory_space<vmem>>, vector<128x128xbf16>
    %cst_16 = arith.constant dense<0.000000e+00> : vector<16x128xf32>
    %34 = tpu.matmul %32, %33, %cst_16 {dimension_numbers = #tpu.dot_dimension_numbers<[1], [0], [0], [1], [0, 0, 1, 1], [], []>} : vector<16x128xbf16>, vector<128x128xbf16>, vector<16x128xf32> -> vector<16x128xf32>
    %c0_17 = arith.constant 0 : index
    %c0_18 = arith.constant 0 : index
    %35 = vector.load %arg6[%c0_17, %c0_18] : memref<1x128xf32, #tpu.memory_space<vmem>>, vector<1x128xf32>
    %36 = vector.broadcast %35 : vector<1x128xf32> to vector<16x128xf32>
    %37 = arith.addf %34, %36 : vector<16x128xf32>
    %38 = arith.mulf %37, %37 : vector<16x128xf32>
    %cst_19 = arith.constant dense<0.000000e+00> : vector<16xf32>
    %39 = vector.multi_reduction <add>, %38, %cst_19 [1] : vector<16x128xf32> to vector<16xf32>
    %40 = vector.shape_cast %39 : vector<16xf32> to vector<16x1xf32>
    %cst_20 = arith.constant 3.125000e-02 : f32
    %41 = vector.broadcast %cst_20 : f32 to vector<16x1xf32>
    %42 = arith.mulf %40, %41 : vector<16x1xf32>
    %c0_21 = arith.constant 0 : index
    %c0_22 = arith.constant 0 : index
    %43 = vector.load %arg7[%c0_21, %c0_22] : memref<1x128xf32, #tpu.memory_space<vmem>>, vector<1x128xf32>
    %cst_23 = arith.constant 9.99999974E-6 : f32
    %44 = vector.broadcast %cst_23 : f32 to vector<16x1xf32>
    %45 = arith.addf %42, %44 : vector<16x1xf32>
    %46 = math.rsqrt %45 : vector<16x1xf32>
    %47 = vector.broadcast %46 : vector<16x1xf32> to vector<16x128xf32>
    %48 = arith.mulf %37, %47 : vector<16x128xf32>
    %49 = vector.broadcast %43 : vector<1x128xf32> to vector<16x128xf32>
    %50 = arith.mulf %49, %48 : vector<16x128xf32>
    %51 = arith.mulf %50, %50 : vector<16x128xf32>
    %52 = arith.mulf %50, %51 : vector<16x128xf32>
    %cst_24 = arith.constant 4.471500e-02 : f32
    %53 = vector.broadcast %cst_24 : f32 to vector<16x128xf32>
    %54 = arith.mulf %53, %52 : vector<16x128xf32>
    %55 = arith.addf %50, %54 : vector<16x128xf32>
    %cst_25 = arith.constant 0.797884583 : f32
    %56 = vector.broadcast %cst_25 : f32 to vector<16x128xf32>
    %57 = arith.mulf %56, %55 : vector<16x128xf32>
    %58 = math.tanh %57 : vector<16x128xf32>
    %cst_26 = arith.constant 1.000000e+00 : f32
    %59 = vector.broadcast %cst_26 : f32 to vector<16x128xf32>
    %60 = arith.addf %59, %58 : vector<16x128xf32>
    %cst_27 = arith.constant 5.000000e-01 : f32
    %61 = vector.broadcast %cst_27 : f32 to vector<16x128xf32>
    %62 = arith.mulf %61, %60 : vector<16x128xf32>
    %63 = arith.mulf %50, %62 : vector<16x128xf32>
    %64 = arith.truncf %63 : vector<16x128xf32> to vector<16x128xbf16>
    %c0_28 = arith.constant 0 : index
    %c0_29 = arith.constant 0 : index
    %65 = vector.load %arg8[%c0_28, %c0_29] : memref<16x128xbf16, #tpu.memory_space<vmem>>, vector<16x128xbf16>
    tpu.vector_store %arg8[%c0_28, %c0_29], %64 {strides = array<i32>} : memref<16x128xbf16, #tpu.memory_space<vmem>>, vector<16x128xbf16>,
    return
  }
  func.func @transform_0(%arg0: i32) -> (i32, i32) {
    %c0_i32 = arith.constant 0 : i32
    %c0_i32_0 = arith.constant 0 : i32
    return %arg0, %c0_i32 : i32, i32
  }
  func.func @transform_1(%arg0: i32) -> (i32, i32) {
    %c0_i32 = arith.constant 0 : i32
    %c0_i32_0 = arith.constant 0 : i32
    %c0_i32_1 = arith.constant 0 : i32
    return %c0_i32, %c0_i32_0 : i32, i32
  }
  func.func @transform_2(%arg0: i32) -> (i32, i32) {
    %c0_i32 = arith.constant 0 : i32
    %c0_i32_0 = arith.constant 0 : i32
    %c0_i32_1 = arith.constant 0 : i32
    return %c0_i32, %c0_i32_0 : i32, i32
  }
  func.func @transform_3(%arg0: i32) -> (i32, i32) {
    %c0_i32 = arith.constant 0 : i32
    %c0_i32_0 = arith.constant 0 : i32
    %c0_i32_1 = arith.constant 0 : i32
    return %c0_i32, %c0_i32_0 : i32, i32
  }
  func.func @transform_4(%arg0: i32) -> (i32, i32) {
    %c0_i32 = arith.constant 0 : i32
    %c0_i32_0 = arith.constant 0 : i32
    %c0_i32_1 = arith.constant 0 : i32
    return %c0_i32, %c0_i32_0 : i32, i32
  }
  func.func @transform_5(%arg0: i32) -> (i32, i32) {
    %c0_i32 = arith.constant 0 : i32
    %c0_i32_0 = arith.constant 0 : i32
    %c0_i32_1 = arith.constant 0 : i32
    return %c0_i32, %c0_i32_0 : i32, i32
  }
  func.func @transform_6(%arg0: i32) -> (i32, i32) {
    %c0_i32 = arith.constant 0 : i32
    %c0_i32_0 = arith.constant 0 : i32
    %c0_i32_1 = arith.constant 0 : i32
    return %c0_i32, %c0_i32_0 : i32, i32
  }
  func.func @transform_7(%arg0: i32) -> (i32, i32) {
    %c0_i32 = arith.constant 0 : i32
    %c0_i32_0 = arith.constant 0 : i32
    return %arg0, %c0_i32 : i32, i32
  }
}

</mosaic_0001>

<bundles_post_ra>
// kernel: tpu_custom_call.1
= control target key start
LH: loop header
LB: loop body
LE: loop exit
PB: predicated region body
PF: predicated region fallthrough
CT: control target
= control target key end

     0   :  { %12 = vsyncpa [#allocation3], 0  ;;  %s683_s0 = inlined_call_operand.hbm [shape: bf16[16,128], index: 0, kind: input, shape index: {}]   ;;  %s684_s1 = inlined_call_operand.hbm [shape: bf16[128,128], index: 1, kind: input, shape index: {}]   ;;  %s685_s2 = inlined_call_operand.vmem [shape: f32[1,128], index: 2, kind: input, shape index: {}]   ;;  %s686_s3 = inlined_call_operand.vmem [shape: f32[1,128], index: 3, kind: input, shape index: {}]   ;;  %s687_s4 = inlined_call_operand.hbm [shape: bf16[128,128], index: 4, kind: input, shape index: {}]   ;;  %s688_s5 = inlined_call_operand.vmem [shape: f32[1,128], index: 5, kind: input, shape index: {}]   ;;  %s689_s6 = inlined_call_operand.vmem [shape: f32[1,128], index: 6, kind: input, shape index: {}]   ;;  %s690_s7 = inlined_call_operand.hbm [shape: bf16[16,128], index: 7, kind: output, shape index: {}]  }
   0x1   :  { %13 = vsyncpa [#allocation6], 0 }
   0x2   :  { %14 = vsyncpa [#allocation4], 0  ;;  %s32_s26 = sshll.u32 %s684_s1, 4  ;;  %s601_s27 = smov [#allocation5]   ;;  %s33_s26 = int_to_ptr.hbm [resolvable:$true] %s32_s26 }
   0x3   :  { %s34_s28 = sshll.u32 %s601_s27, 4  ;;  %s19_s8 = sshll.u32 %s683_s0, 4  ;;  %s35_s28 = int_to_ptr.vmem [resolvable:$true] %s34_s28  ;;  %s20_s8 = int_to_ptr.hbm [resolvable:$true] %s19_s8 }
   0x4   :  { %s602_s9 = smov 64   ;;  %s603_s10 = smov 4  }
   0x5   :  { %40 = dma.hbm_to_vmem [thread:$0]  %s33_s26, 1024, %s35_s28, [#allocation6], %s602_s9, %s602_s9, %s603_s10  }
   0x6   :  { %s604_s11 = smov [#allocation2]   ;;  %s49_s1 = sshll.u32 %s687_s4, 4  ;;  %s50_s1 = int_to_ptr.hbm [resolvable:$true] %s49_s1 }
   0x7   :  { %s21_s12 = sshll.u32 %s604_s11, 4  ;;  %s605_s0 = smov [#allocation7]   ;;  %s22_s12 = int_to_ptr.vmem [resolvable:$true] %s21_s12 }
   0x8   :  { %27 = dma.hbm_to_vmem [thread:$0]  %s20_s8, 128, %s22_s12, [#allocation3], %s602_s9, %s602_s9, %s603_s10  }
   0x9   :  { %s51_s15 = sshll.u32 %s605_s0, 4  ;;  %s52_s15 = int_to_ptr.vmem [resolvable:$true] %s51_s15 }
   0xa   :  { %57 = dma.hbm_to_vmem [thread:$0]  %s50_s1, 1024, %s52_s15, [#allocation6], %s602_s9, %s602_s9, %s603_s10  }
   0xb   :  { %595 = dma.done.wait [#allocation3], 128  }
   0xc   :  { %596 = vsyncadd [#allocation3], 4294967168 }
   0xd   :  { %597 = dma.done.wait [#allocation6], 2048  }
   0xe   :  { %598 = vsyncadd [#allocation6], 4294965248  ;;  %v459_v0 = vld [vmem:[#allocation5 + $0x38] sm:$0xff]  ;;  %v458_v1 = vld [vmem:[#allocation5 + $0x30] sm:$0xff]  ;;  %s369_s23 = sshll.u32 %s690_s7, 4  ;;  %s370_s23 = int_to_ptr.hbm [resolvable:$true] %s369_s23 }
   0xf   :  { %150 = vmatpush.bf16.msra.mxu0 %v459_v0  ;;  %v457_v2 = vld [vmem:[#allocation5 + $0x28] sm:$0xff]  ;;  %v456_v3 = vld [vmem:[#allocation5 + $0x20] sm:$0xff]  ;;  %v455_v4 = vld [vmem:[#allocation5 + $0x18] sm:$0xff] }
  0x10   :  { %v454_v5 = vld [vmem:[#allocation5 + $0x10] sm:$0xff]  ;;  %v453_v6 = vld [vmem:[#allocation5 + $0x8] sm:$0xff]  ;;  %v452_v7 = vld [vmem:[#allocation5] sm:$0xff] }
  0x11   :  { %v451_v8 = vld [vmem:[#allocation2] sm:$0xff]  ;;  %v466_v17 = vld [vmem:[#allocation7 + $0x30] sm:$0xff]  ;;  %v465_v20 = vld [vmem:[#allocation7 + $0x28] sm:$0xff] }
  0x12   :  { %v479_v9 = vld [vmem:[%s685_s2] ss:$0 sm:$0xff]  ;;  %v464_v22 = vld [vmem:[#allocation7 + $0x20] sm:$0xff]  ;;  %v462_v29 = vld [vmem:[#allocation7 + $0x10] sm:$0xff] }
  0x13   :  { %151 = vmatpush.bf16.msra.mxu0 %v458_v1  ;;  %v467_v16 = vld [vmem:[#allocation7 + $0x38] sm:$0xff]  ;;  %v461_v32 = vld [vmem:[#allocation7 + $0x8] sm:$0xff]  ;;  %v460_v38 = vld [vmem:[#allocation7] sm:$0xff] }
  0x14   :  { %289 = vmatpush.bf16.msra.mxu1 %v467_v16  ;;  %v463_v25 = vld [vmem:[#allocation7 + $0x18] sm:$0xff] }
  0x15   :  { %v480_v37 = vld [vmem:[%s686_s3] ss:$0 sm:$0xff] }
  0x17   :  { %152 = vmatpush.bf16.msra.mxu0 %v457_v2 }
  0x18   :  { %290 = vmatpush.bf16.msra.mxu1 %v466_v17 }
  0x1b   :  { %153 = vmatpush.bf16.msra.mxu0 %v456_v3 }
  0x1c   :  { %291 = vmatpush.bf16.msra.mxu1 %v465_v20 }
  0x1f   :  { %154 = vmatpush.bf16.msra.mxu0 %v455_v4  ;;  %v481_v4 = vld [vmem:[%s688_s5] ss:$0 sm:$0xff] }
  0x20   :  { %292 = vmatpush.bf16.msra.mxu1 %v464_v22 }
  0x23   :  { %155 = vmatpush.bf16.msra.mxu0 %v454_v5 }
  0x24   :  { %293 = vmatpush.bf16.msra.mxu1 %v463_v25  ;;  %v482_v25 = vld [vmem:[%s689_s6] ss:$0 sm:$0xff]  ;;  %s606_s6 = smov [#allocation8]  }
  0x25   :  { %s367_s20 = sshll.u32 %s606_s6, 4  ;;  %s368_s20 = int_to_ptr.vmem [resolvable:$true] %s367_s20 }
  0x27   :  { %156 = vmatpush.bf16.msra.mxu0 %v453_v6 }
  0x28   :  { %294 = vmatpush.bf16.msra.mxu1 %v462_v29 }
  0x2b   :  { %157 = vmatpush.bf16.msra.mxu0 %v452_v7 }
  0x2c   :  { %295 = vmatpush.bf16.msra.mxu1 %v461_v32 }
  0x2e   :  { %158 = vmatmul.bf16.vlgmr.msra.gmra.mxu0 %v451_v8 }
  0x30   :  { %296 = vmatpush.bf16.msra.mxu1 %v460_v38 }
  0xab   :  { %v159_v10 = vpop.f32.mrf.mxu0 }
  0xac   :  { %v160_v11 = vadd.f32 %v479_v9, %v159_v10 }
  0xae   :  { %v164_v12 = vmul.f32 %v160_v11, %v160_v11 }
  0xb0   :  { %166 = vadd.xlane.f32.xlu0 %v164_v12 }
  0xb3   :  { %v161_v13 = vpop.f32.mrf.mxu0 }
  0xb4   :  { %v162_v14 = vadd.f32 %v479_v9, %v161_v13 }
  0xb6   :  { %v165_v15 = vmul.f32 %v162_v14, %v162_v14 }
  0xb8   :  { %168 = vadd.xlane.f32.xlu0 %v165_v15 }
 0x123   :  { %v167_v18 = vpop.xlane.xlu0 %166 }
 0x124   :  { %v170_v19 = vmul.f32 0.03125, %v167_v18 }
 0x126   :  { %v173_v21 = vadd.f32 1e-05, %v170_v19 }
 0x128   :  { %483 = vrsqrt.f32 %v173_v21  ;;  %vm181_vm1 = vweird.f32 %v173_v21 }
 0x12b   :  { %v169_v23 = vpop.xlane.xlu0 %168 }
 0x12c   :  { %v171_v24 = vmul.f32 0.03125, %v169_v23 }
 0x12e   :  { %v484_v26 = vpop.eup %483  ;;  %v174_v27 = vadd.f32 1e-05, %v171_v24 }
 0x12f   :  { %v176_v28 = vmul.f32 %v484_v26, %v173_v21  ;;  %vm182_vm0 = vweird.f32 %v484_v26 }
 0x130   :  { %485 = vrsqrt.f32 %v174_v27  ;;  %vm183_vm2 = vmor %vm181_vm1, %vm182_vm0  ;;  %vm191_vm4 = vweird.f32 %v174_v27 }
 0x131   :  { %v177_v30 = vmul.f32 %v484_v26, %v176_v28 }
 0x133   :  { %v178_v31 = vmul.f32 0.5, %v177_v30 }
 0x135   :  { %v179_v33 = vsub.f32 1.5, %v178_v31 }
 0x136   :  { %v486_v34 = vpop.eup %485 }
 0x137   :  { %v180_v35 = vmul.f32 %v484_v26, %v179_v33  ;;  %v186_v36 = vmul.f32 %v486_v34, %v174_v27  ;;  %vm192_vm3 = vweird.f32 %v486_v34 }
 0x138   :  { %vm193_vm5 = vmor %vm191_vm4, %vm192_vm3 }
 0x139   :  { %v184_v39 = vsel %vm183_vm2, %v484_v26, %v180_v35  ;;  %v187_v40 = vmul.f32 %v486_v34, %v186_v36 }
 0x13a   :  { %v195_v41 = vmul.f32 %v184_v39, %v160_v11 }
 0x13b   :  { %v188_v42 = vmul.f32 0.5, %v187_v40 }
 0x13c   :  { %v200_v43 = vmul.f32 %v480_v37, %v195_v41 }
 0x13d   :  { %v189_v44 = vsub.f32 1.5, %v188_v42 }
 0x13e   :  { %v202_v45 = vmul.f32 %v200_v43, %v200_v43 }
 0x13f   :  { %v190_v46 = vmul.f32 %v486_v34, %v189_v44 }
 0x140   :  { %v204_v47 = vmul.f32 %v202_v45, %v200_v43 }
 0x141   :  { %v194_v48 = vsel %vm193_vm5, %v486_v34, %v190_v46 }
 0x142   :  { %v196_v49 = vmul.f32 %v194_v48, %v162_v14  ;;  %v206_v50 = vmul.f32 0.044715, %v204_v47 }
 0x144   :  { %v201_v51 = vmul.f32 %v480_v37, %v196_v49  ;;  %v208_v52 = vadd.f32 %v206_v50, %v200_v43 }
 0x146   :  { %v203_v53 = vmul.f32 %v201_v51, %v201_v51  ;;  %v210_v54 = vmul.f32 0.7978846, %v208_v52 }
 0x148   :  { %v205_v55 = vmul.f32 %v203_v53, %v201_v51  ;;  %487 = vtanh.f32 %v210_v54 }
 0x14a   :  { %v207_v56 = vmul.f32 0.044715, %v205_v55 }
 0x14c   :  { %v209_v57 = vadd.f32 %v207_v56, %v201_v51 }
 0x14e   :  { %v211_v58 = vmul.f32 0.7978846, %v209_v57  ;;  %v488_v59 = vpop.eup %487 }
 0x14f   :  { %v214_v60 = vadd.f32 1.0, %v488_v59 }
 0x150   :  { %489 = vtanh.f32 %v211_v58 }
 0x151   :  { %v216_v63 = vmul.f32 0.5, %v214_v60 }
 0x153   :  { %v218_v1 = vmul.f32 %v216_v63, %v200_v43 }
 0x156   :  { %v490_v61 = vpop.eup %489 }
 0x157   :  { %v215_v62 = vadd.f32 1.0, %v490_v61 }
 0x159   :  { %v217_v0 = vmul.f32 0.5, %v215_v62 }
 0x15b   :  { %v219_v2 = vmul.f32 %v217_v0, %v201_v51 }
 0x15d   :  { %v220_v3 = vpack.c.bf16 %v219_v2, %v218_v1 }
 0x15f   :  { %297 = vmatmul.bf16.vlgmr.msra.gmra.mxu1 %v220_v3 }
 0x1dc   :  { %v298_v5 = vpop.f32.mrf.mxu1 }
 0x1dd   :  { %v299_v6 = vadd.f32 %v481_v4, %v298_v5 }
 0x1df   :  { %v303_v7 = vmul.f32 %v299_v6, %v299_v6 }
 0x1e1   :  { %305 = vadd.xlane.f32.xlu1 %v303_v7 }
 0x1e4   :  { %v300_v8 = vpop.f32.mrf.mxu1 }
 0x1e5   :  { %v301_v9 = vadd.f32 %v481_v4, %v300_v8 }
 0x1e7   :  { %v304_v10 = vmul.f32 %v301_v9, %v301_v9 }
 0x1e9   :  { %307 = vadd.xlane.f32.xlu1 %v304_v10 }
 0x254   :  { %v306_v11 = vpop.xlane.xlu1 %305 }
 0x255   :  { %v309_v12 = vmul.f32 0.03125, %v306_v11 }
 0x257   :  { %v312_v13 = vadd.f32 1e-05, %v309_v12 }
 0x259   :  { %491 = vrsqrt.f32 %v312_v13  ;;  %vm320_vm7 = vweird.f32 %v312_v13 }
 0x25c   :  { %v308_v14 = vpop.xlane.xlu1 %307 }
 0x25d   :  { %v310_v15 = vmul.f32 0.03125, %v308_v14 }
 0x25f   :  { %v492_v16 = vpop.eup %491  ;;  %v313_v17 = vadd.f32 1e-05, %v310_v15 }
 0x260   :  { %v315_v18 = vmul.f32 %v492_v16, %v312_v13  ;;  %vm321_vm6 = vweird.f32 %v492_v16 }
 0x261   :  { %493 = vrsqrt.f32 %v313_v17  ;;  %vm322_vm8 = vmor %vm320_vm7, %vm321_vm6  ;;  %vm330_vm10 = vweird.f32 %v313_v17 }
 0x262   :  { %v316_v19 = vmul.f32 %v492_v16, %v315_v18 }
 0x264   :  { %v317_v20 = vmul.f32 0.5, %v316_v19 }
 0x266   :  { %v318_v21 = vsub.f32 1.5, %v317_v20 }
 0x267   :  { %v494_v22 = vpop.eup %493 }
 0x268   :  { %v319_v23 = vmul.f32 %v492_v16, %v318_v21  ;;  %v325_v24 = vmul.f32 %v494_v22, %v313_v17  ;;  %vm331_vm9 = vweird.f32 %v494_v22 }
 0x269   :  { %vm332_vm11 = vmor %vm330_vm10, %vm331_vm9 }
 0x26a   :  { %v323_v26 = vsel %vm322_vm8, %v492_v16, %v319_v23  ;;  %v326_v27 = vmul.f32 %v494_v22, %v325_v24 }
 0x26b   :  { %v334_v28 = vmul.f32 %v323_v26, %v299_v6 }
 0x26c   :  { %v327_v29 = vmul.f32 0.5, %v326_v27 }
 0x26d   :  { %v339_v30 = vmul.f32 %v482_v25, %v334_v28 }
 0x26e   :  { %v328_v31 = vsub.f32 1.5, %v327_v29 }
 0x26f   :  { %v341_v32 = vmul.f32 %v339_v30, %v339_v30 }
 0x270   :  { %v329_v33 = vmul.f32 %v494_v22, %v328_v31 }
 0x271   :  { %v343_v34 = vmul.f32 %v341_v32, %v339_v30 }
 0x272   :  { %v333_v35 = vsel %vm332_vm11, %v494_v22, %v329_v33 }
 0x273   :  { %v335_v36 = vmul.f32 %v333_v35, %v301_v9  ;;  %v345_v37 = vmul.f32 0.044715, %v343_v34 }
 0x275   :  { %v340_v38 = vmul.f32 %v482_v25, %v335_v36  ;;  %v347_v39 = vadd.f32 %v345_v37, %v339_v30 }
 0x277   :  { %v342_v40 = vmul.f32 %v340_v38, %v340_v38  ;;  %v349_v41 = vmul.f32 0.7978846, %v347_v39 }
 0x279   :  { %v344_v42 = vmul.f32 %v342_v40, %v340_v38  ;;  %495 = vtanh.f32 %v349_v41 }
 0x27b   :  { %v346_v43 = vmul.f32 0.044715, %v344_v42 }
 0x27d   :  { %v348_v44 = vadd.f32 %v346_v43, %v340_v38 }
 0x27f   :  { %v350_v45 = vmul.f32 0.7978846, %v348_v44  ;;  %v496_v46 = vpop.eup %495 }
 0x280   :  { %v353_v47 = vadd.f32 1.0, %v496_v46 }
 0x281   :  { %497 = vtanh.f32 %v350_v45 }
 0x282   :  { %v355_v50 = vmul.f32 0.5, %v353_v47 }
 0x284   :  { %v357_v52 = vmul.f32 %v355_v50, %v339_v30 }
 0x287   :  { %v498_v48 = vpop.eup %497 }
 0x288   :  { %v354_v49 = vadd.f32 1.0, %v498_v48 }
 0x28a   :  { %v356_v51 = vmul.f32 0.5, %v354_v49 }
 0x28c   :  { %v358_v53 = vmul.f32 %v356_v51, %v340_v38 }
 0x28e   :  { %v471_v54 = vpack.c.bf16 %v358_v53, %v357_v52 }
 0x290   :  { %472 = vst [vmem:[#allocation8] sm:$0xff] %v471_v54  }
 0x291   :  { %375 = dma.vmem_to_hbm [thread:$0]  %s368_s20, 128, %s370_s23, [#allocation4], %s602_s9, %s602_s9, %s603_s10  }
 0x292   :  { %599 = dma.done.wait [#allocation4], 128  }
 0x293   :  { %600 = vsyncadd [#allocation4], 4294967168 }
 0x294   :  { %380 = vsyncpa [#allocation3], 1 }
 0x295   :  { %381 = vsyncpa [#allocation6], 1 }
 0x296   :  { %382 = vsyncpa [#allocation4], 1 }

// kernel: tpu_custom_call.1
= control target key start
LH: loop header
LB: loop body
LE: loop exit
PB: predicated region body
PF: predicated region fallthrough
CT: control target
= control target key end

     0   :  { %12 = vsyncpa [#allocation3], 0  ;;  %s683_s0 = inlined_call_operand.hbm [shape: bf16[16,128], index: 0, kind: input, shape index: {}]   ;;  %s684_s1 = inlined_call_operand.hbm [shape: bf16[128,128], index: 1, kind: input, shape index: {}]   ;;  %s685_s2 = inlined_call_operand.vmem [shape: f32[1,128], index: 2, kind: input, shape index: {}]   ;;  %s686_s3 = inlined_call_operand.vmem [shape: f32[1,128], index: 3, kind: input, shape index: {}]   ;;  %s687_s4 = inlined_call_operand.hbm [shape: bf16[128,128], index: 4, kind: input, shape index: {}]   ;;  %s688_s5 = inlined_call_operand.vmem [shape: f32[1,128], index: 5, kind: input, shape index: {}]   ;;  %s689_s6 = inlined_call_operand.vmem [shape: f32[1,128], index: 6, kind: input, shape index: {}]   ;;  %s690_s7 = inlined_call_operand.hbm [shape: bf16[16,128], index: 7, kind: output, shape index: {}]  }
   0x1   :  { %13 = vsyncpa [#allocation6], 0 }
   0x2   :  { %14 = vsyncpa [#allocation4], 0  ;;  %s32_s26 = sshll.u32 %s684_s1, 4  ;;  %s601_s27 = smov [#allocation5]   ;;  %s33_s26 = int_to_ptr.hbm [resolvable:$true] %s32_s26 }
   0x3   :  { %s34_s28 = sshll.u32 %s601_s27, 4  ;;  %s19_s8 = sshll.u32 %s683_s0, 4  ;;  %s35_s28 = int_to_ptr.vmem [resolvable:$true] %s34_s28  ;;  %s20_s8 = int_to_ptr.hbm [resolvable:$true] %s19_s8 }
   0x4   :  { %s602_s9 = smov 64   ;;  %s603_s10 = smov 4  }
   0x5   :  { %40 = dma.hbm_to_vmem [thread:$0]  %s33_s26, 1024, %s35_s28, [#allocation6], %s602_s9, %s602_s9, %s603_s10  }
   0x6   :  { %s604_s11 = smov [#allocation2]   ;;  %s49_s1 = sshll.u32 %s687_s4, 4  ;;  %s50_s1 = int_to_ptr.hbm [resolvable:$true] %s49_s1 }
   0x7   :  { %s21_s12 = sshll.u32 %s604_s11, 4  ;;  %s605_s0 = smov [#allocation7]   ;;  %s22_s12 = int_to_ptr.vmem [resolvable:$true] %s21_s12 }
   0x8   :  { %27 = dma.hbm_to_vmem [thread:$0]  %s20_s8, 128, %s22_s12, [#allocation3], %s602_s9, %s602_s9, %s603_s10  }
   0x9   :  { %s51_s15 = sshll.u32 %s605_s0, 4  ;;  %s52_s15 = int_to_ptr.vmem [resolvable:$true] %s51_s15 }
   0xa   :  { %57 = dma.hbm_to_vmem [thread:$0]  %s50_s1, 1024, %s52_s15, [#allocation6], %s602_s9, %s602_s9, %s603_s10  }
   0xb   :  { %595 = dma.done.wait [#allocation3], 128  }
   0xc   :  { %596 = vsyncadd [#allocation3], 4294967168 }
   0xd   :  { %597 = dma.done.wait [#allocation6], 2048  }
   0xe   :  { %598 = vsyncadd [#allocation6], 4294965248  ;;  %v459_v0 = vld [vmem:[#allocation5 + $0x38] sm:$0xff]  ;;  %v458_v1 = vld [vmem:[#allocation5 + $0x30] sm:$0xff]  ;;  %s369_s23 = sshll.u32 %s690_s7, 4  ;;  %s370_s23 = int_to_ptr.hbm [resolvable:$true] %s369_s23 }
   0xf   :  { %150 = vmatpush.bf16.msra.mxu0 %v459_v0  ;;  %v457_v2 = vld [vmem:[#allocation5 + $0x28] sm:$0xff]  ;;  %v456_v3 = vld [vmem:[#allocation5 + $0x20] sm:$0xff]  ;;  %v455_v4 = vld [vmem:[#allocation5 + $0x18] sm:$0xff] }
  0x10   :  { %v454_v5 = vld [vmem:[#allocation5 + $0x10] sm:$0xff]  ;;  %v453_v6 = vld [vmem:[#allocation5 + $0x8] sm:$0xff]  ;;  %v452_v7 = vld [vmem:[#allocation5] sm:$0xff] }
  0x11   :  { %v451_v8 = vld [vmem:[#allocation2] sm:$0xff]  ;;  %v466_v17 = vld [vmem:[#allocation7 + $0x30] sm:$0xff]  ;;  %v465_v20 = vld [vmem:[#allocation7 + $0x28] sm:$0xff] }
  0x12   :  { %v479_v9 = vld [vmem:[%s685_s2] ss:$0 sm:$0xff]  ;;  %v464_v22 = vld [vmem:[#allocation7 + $0x20] sm:$0xff]  ;;  %v462_v29 = vld [vmem:[#allocation7 + $0x10] sm:$0xff] }
  0x13   :  { %151 = vmatpush.bf16.msra.mxu0 %v458_v1  ;;  %v467_v16 = vld [vmem:[#allocation7 + $0x38] sm:$0xff]  ;;  %v461_v32 = vld [vmem:[#allocation7 + $0x8] sm:$0xff]  ;;  %v460_v38 = vld [vmem:[#allocation7] sm:$0xff] }
  0x14   :  { %289 = vmatpush.bf16.msra.mxu1 %v467_v16  ;;  %v463_v25 = vld [vmem:[#allocation7 + $0x18] sm:$0xff] }
  0x15   :  { %v480_v37 = vld [vmem:[%s686_s3] ss:$0 sm:$0xff] }
  0x17   :  { %152 = vmatpush.bf16.msra.mxu0 %v457_v2 }
  0x18   :  { %290 = vmatpush.bf16.msra.mxu1 %v466_v17 }
  0x1b   :  { %153 = vmatpush.bf16.msra.mxu0 %v456_v3 }
  0x1c   :  { %291 = vmatpush.bf16.msra.mxu1 %v465_v20 }
  0x1f   :  { %154 = vmatpush.bf16.msra.mxu0 %v455_v4  ;;  %v481_v4 = vld [vmem:[%s688_s5] ss:$0 sm:$0xff] }
  0x20   :  { %292 = vmatpush.bf16.msra.mxu1 %v464_v22 }
  0x23   :  { %155 = vmatpush.bf16.msra.mxu0 %v454_v5 }
  0x24   :  { %293 = vmatpush.bf16.msra.mxu1 %v463_v25  ;;  %v482_v25 = vld [vmem:[%s689_s6] ss:$0 sm:$0xff]  ;;  %s606_s6 = smov [#allocation8]  }
  0x25   :  { %s367_s20 = sshll.u32 %s606_s6, 4  ;;  %s368_s20 = int_to_ptr.vmem [resolvable:$true] %s367_s20 }
  0x27   :  { %156 = vmatpush.bf16.msra.mxu0 %v453_v6 }
  0x28   :  { %294 = vmatpush.bf16.msra.mxu1 %v462_v29 }
  0x2b   :  { %157 = vmatpush.bf16.msra.mxu0 %v452_v7 }
  0x2c   :  { %295 = vmatpush.bf16.msra.mxu1 %v461_v32 }
  0x2e   :  { %158 = vmatmul.bf16.vlgmr.msra.gmra.mxu0 %v451_v8 }
  0x30   :  { %296 = vmatpush.bf16.msra.mxu1 %v460_v38 }
  0xab   :  { %v159_v10 = vpop.f32.mrf.mxu0 }
  0xac   :  { %v160_v11 = vadd.f32 %v479_v9, %v159_v10 }
  0xae   :  { %v164_v12 = vmul.f32 %v160_v11, %v160_v11 }
  0xb0   :  { %166 = vadd.xlane.f32.xlu0 %v164_v12 }
  0xb3   :  { %v161_v13 = vpop.f32.mrf.mxu0 }
  0xb4   :  { %v162_v14 = vadd.f32 %v479_v9, %v161_v13 }
  0xb6   :  { %v165_v15 = vmul.f32 %v162_v14, %v162_v14 }
  0xb8   :  { %168 = vadd.xlane.f32.xlu0 %v165_v15 }
 0x123   :  { %v167_v18 = vpop.xlane.xlu0 %166 }
 0x124   :  { %v170_v19 = vmul.f32 0.03125, %v167_v18 }
 0x126   :  { %v173_v21 = vadd.f32 1e-05, %v170_v19 }
 0x128   :  { %483 = vrsqrt.f32 %v173_v21  ;;  %vm181_vm1 = vweird.f32 %v173_v21 }
 0x12b   :  { %v169_v23 = vpop.xlane.xlu0 %168 }
 0x12c   :  { %v171_v24 = vmul.f32 0.03125, %v169_v23 }
 0x12e   :  { %v484_v26 = vpop.eup %483  ;;  %v174_v27 = vadd.f32 1e-05, %v171_v24 }
 0x12f   :  { %v176_v28 = vmul.f32 %v484_v26, %v173_v21  ;;  %vm182_vm0 = vweird.f32 %v484_v26 }
 0x130   :  { %485 = vrsqrt.f32 %v174_v27  ;;  %vm183_vm2 = vmor %vm181_vm1, %vm182_vm0  ;;  %vm191_vm4 = vweird.f32 %v174_v27 }
 0x131   :  { %v177_v30 = vmul.f32 %v484_v26, %v176_v28 }
 0x133   :  { %v178_v31 = vmul.f32 0.5, %v177_v30 }
 0x135   :  { %v179_v33 = vsub.f32 1.5, %v178_v31 }
 0x136   :  { %v486_v34 = vpop.eup %485 }
 0x137   :  { %v180_v35 = vmul.f32 %v484_v26, %v179_v33  ;;  %v186_v36 = vmul.f32 %v486_v34, %v174_v27  ;;  %vm192_vm3 = vweird.f32 %v486_v34 }
 0x138   :  { %vm193_vm5 = vmor %vm191_vm4, %vm192_vm3 }
 0x139   :  { %v184_v39 = vsel %vm183_vm2, %v484_v26, %v180_v35  ;;  %v187_v40 = vmul.f32 %v486_v34, %v186_v36 }
 0x13a   :  { %v195_v41 = vmul.f32 %v184_v39, %v160_v11 }
 0x13b   :  { %v188_v42 = vmul.f32 0.5, %v187_v40 }
 0x13c   :  { %v200_v43 = vmul.f32 %v480_v37, %v195_v41 }
 0x13d   :  { %v189_v44 = vsub.f32 1.5, %v188_v42 }
 0x13e   :  { %v202_v45 = vmul.f32 %v200_v43, %v200_v43 }
 0x13f   :  { %v190_v46 = vmul.f32 %v486_v34, %v189_v44 }
 0x140   :  { %v204_v47 = vmul.f32 %v202_v45, %v200_v43 }
 0x141   :  { %v194_v48 = vsel %vm193_vm5, %v486_v34, %v190_v46 }
 0x142   :  { %v196_v49 = vmul.f32 %v194_v48, %v162_v14  ;;  %v206_v50 = vmul.f32 0.044715, %v204_v47 }
 0x144   :  { %v201_v51 = vmul.f32 %v480_v37, %v196_v49  ;;  %v208_v52 = vadd.f32 %v206_v50, %v200_v43 }
 0x146   :  { %v203_v53 = vmul.f32 %v201_v51, %v201_v51  ;;  %v210_v54 = vmul.f32 0.7978846, %v208_v52 }
 0x148   :  { %v205_v55 = vmul.f32 %v203_v53, %v201_v51  ;;  %487 = vtanh.f32 %v210_v54 }
 0x14a   :  { %v207_v56 = vmul.f32 0.044715, %v205_v55 }
 0x14c   :  { %v209_v57 = vadd.f32 %v207_v56, %v201_v51 }
 0x14e   :  { %v211_v58 = vmul.f32 0.7978846, %v209_v57  ;;  %v488_v59 = vpop.eup %487 }
 0x14f   :  { %v214_v60 = vadd.f32 1.0, %v488_v59 }
 0x150   :  { %489 = vtanh.f32 %v211_v58 }
 0x151   :  { %v216_v63 = vmul.f32 0.5, %v214_v60 }
 0x153   :  { %v218_v1 = vmul.f32 %v216_v63, %v200_v43 }
 0x156   :  { %v490_v61 = vpop.eup %489 }
 0x157   :  { %v215_v62 = vadd.f32 1.0, %v490_v61 }
 0x159   :  { %v217_v0 = vmul.f32 0.5, %v215_v62 }
 0x15b   :  { %v219_v2 = vmul.f32 %v217_v0, %v201_v51 }
 0x15d   :  { %v220_v3 = vpack.c.bf16 %v219_v2, %v218_v1 }
 0x15f   :  { %297 = vmatmul.bf16.vlgmr.msra.gmra.mxu1 %v220_v3 }
 0x1dc   :  { %v298_v5 = vpop.f32.mrf.mxu1 }
 0x1dd   :  { %v299_v6 = vadd.f32 %v481_v4, %v298_v5 }
 0x1df   :  { %v303_v7 = vmul.f32 %v299_v6, %v299_v6 }
 0x1e1   :  { %305 = vadd.xlane.f32.xlu1 %v303_v7 }
 0x1e4   :  { %v300_v8 = vpop.f32.mrf.mxu1 }
 0x1e5   :  { %v301_v9 = vadd.f32 %v481_v4, %v300_v8 }
 0x1e7   :  { %v304_v10 = vmul.f32 %v301_v9, %v301_v9 }
 0x1e9   :  { %307 = vadd.xlane.f32.xlu1 %v304_v10 }
 0x254   :  { %v306_v11 = vpop.xlane.xlu1 %305 }
 0x255   :  { %v309_v12 = vmul.f32 0.03125, %v306_v11 }
 0x257   :  { %v312_v13 = vadd.f32 1e-05, %v309_v12 }
 0x259   :  { %491 = vrsqrt.f32 %v312_v13  ;;  %vm320_vm7 = vweird.f32 %v312_v13 }
 0x25c   :  { %v308_v14 = vpop.xlane.xlu1 %307 }
 0x25d   :  { %v310_v15 = vmul.f32 0.03125, %v308_v14 }
 0x25f   :  { %v492_v16 = vpop.eup %491  ;;  %v313_v17 = vadd.f32 1e-05, %v310_v15 }
 0x260   :  { %v315_v18 = vmul.f32 %v492_v16, %v312_v13  ;;  %vm321_vm6 = vweird.f32 %v492_v16 }
 0x261   :  { %493 = vrsqrt.f32 %v313_v17  ;;  %vm322_vm8 = vmor %vm320_vm7, %vm321_vm6  ;;  %vm330_vm10 = vweird.f32 %v313_v17 }
 0x262   :  { %v316_v19 = vmul.f32 %v492_v16, %v315_v18 }
 0x264   :  { %v317_v20 = vmul.f32 0.5, %v316_v19 }
 0x266   :  { %v318_v21 = vsub.f32 1.5, %v317_v20 }
 0x267   :  { %v494_v22 = vpop.eup %493 }
 0x268   :  { %v319_v23 = vmul.f32 %v492_v16, %v318_v21  ;;  %v325_v24 = vmul.f32 %v494_v22, %v313_v17  ;;  %vm331_vm9 = vweird.f32 %v494_v22 }
 0x269   :  { %vm332_vm11 = vmor %vm330_vm10, %vm331_vm9 }
 0x26a   :  { %v323_v26 = vsel %vm322_vm8, %v492_v16, %v319_v23  ;;  %v326_v27 = vmul.f32 %v494_v22, %v325_v24 }
 0x26b   :  { %v334_v28 = vmul.f32 %v323_v26, %v299_v6 }
 0x26c   :  { %v327_v29 = vmul.f32 0.5, %v326_v27 }
 0x26d   :  { %v339_v30 = vmul.f32 %v482_v25, %v334_v28 }
 0x26e   :  { %v328_v31 = vsub.f32 1.5, %v327_v29 }
 0x26f   :  { %v341_v32 = vmul.f32 %v339_v30, %v339_v30 }
 0x270   :  { %v329_v33 = vmul.f32 %v494_v22, %v328_v31 }
 0x271   :  { %v343_v34 = vmul.f32 %v341_v32, %v339_v30 }
 0x272   :  { %v333_v35 = vsel %vm332_vm11, %v494_v22, %v329_v33 }
 0x273   :  { %v335_v36 = vmul.f32 %v333_v35, %v301_v9  ;;  %v345_v37 = vmul.f32 0.044715, %v343_v34 }
 0x275   :  { %v340_v38 = vmul.f32 %v482_v25, %v335_v36  ;;  %v347_v39 = vadd.f32 %v345_v37, %v339_v30 }
 0x277   :  { %v342_v40 = vmul.f32 %v340_v38, %v340_v38  ;;  %v349_v41 = vmul.f32 0.7978846, %v347_v39 }
 0x279   :  { %v344_v42 = vmul.f32 %v342_v40, %v340_v38  ;;  %495 = vtanh.f32 %v349_v41 }
 0x27b   :  { %v346_v43 = vmul.f32 0.044715, %v344_v42 }
 0x27d   :  { %v348_v44 = vadd.f32 %v346_v43, %v340_v38 }
 0x27f   :  { %v350_v45 = vmul.f32 0.7978846, %v348_v44  ;;  %v496_v46 = vpop.eup %495 }
 0x280   :  { %v353_v47 = vadd.f32 1.0, %v496_v46 }
 0x281   :  { %497 = vtanh.f32 %v350_v45 }
 0x282   :  { %v355_v50 = vmul.f32 0.5, %v353_v47 }
 0x284   :  { %v357_v52 = vmul.f32 %v355_v50, %v339_v30 }
 0x287   :  { %v498_v48 = vpop.eup %497 }
 0x288   :  { %v354_v49 = vadd.f32 1.0, %v498_v48 }
 0x28a   :  { %v356_v51 = vmul.f32 0.5, %v354_v49 }
 0x28c   :  { %v358_v53 = vmul.f32 %v356_v51, %v340_v38 }
 0x28e   :  { %v471_v54 = vpack.c.bf16 %v358_v53, %v357_v52 }
 0x290   :  { %472 = vst [vmem:[#allocation8] sm:$0xff] %v471_v54  }
 0x291   :  { %375 = dma.vmem_to_hbm [thread:$0]  %s368_s20, 128, %s370_s23, [#allocation4], %s602_s9, %s602_s9, %s603_s10  }
 0x292   :  { %599 = dma.done.wait [#allocation4], 128  }
 0x293   :  { %600 = vsyncadd [#allocation4], 4294967168 }
 0x294   :  { %380 = vsyncpa [#allocation3], 1 }
 0x295   :  { %381 = vsyncpa [#allocation6], 1 }
 0x296   :  { %382 = vsyncpa [#allocation4], 1 }

</bundles_post_ra>
